<compile_context>
chip_gen: v5e
topology: v5e:2x2
jax: 0.10.0
libtpu: 0.0.40
codegen_flags: <defaults>
</compile_context>

<pallas_src>
import functools

import jax
import jax.numpy as jnp
from jax import lax
from jax.experimental import pallas as pl
from jax.experimental.pallas import tpu as pltpu

EPS = 1e-5  # BatchNorm1d default


# ---------------------------------------------------------------------------
# Sizing helpers
# ---------------------------------------------------------------------------

def _round_up(v, m):
    return ((v + m - 1) // m) * m


def _vmem_budget():
    """Returns (physical VMEM per core, scoped-VMEM budget to request)."""
    try:
        cap = int(pltpu.get_tpu_info().vmem_capacity_bytes)
    except Exception:
        cap = 64 * 1024 * 1024          # conservative fallback (v7x per-TC size)
    # Review: do not clamp 128-MiB parts to 64 MiB -- use ~0.75*cap.
    return cap, (cap * 3) // 4


# ---------------------------------------------------------------------------
# Kernels
# ---------------------------------------------------------------------------

def _fused_kernel(x_ref, pos_ref, gamma_ref, beta_ref, o_ref,
                  y_scr, sum_scr, sq_scr, scale_scr, shift_scr,
                  *, tile_s, S, inv_n):
    """Pipelined fused path.  grid = (2, num_tiles).

    phase 0: stream x tiles, y = x + pos -> resident f32 scratch, accumulate stats.
    phase 1: compute fused affine once, normalize out of scratch, write tiles back.
    """
    phase = pl.program_id(0)
    i = pl.program_id(1)

    @pl.when(phase == 0)
    def _():
        @pl.when(i == 0)
        def _():
            sum_scr[...] = jnp.zeros_like(sum_scr)
            sq_scr[...] = jnp.zeros_like(sq_scr)

        y = x_ref[...].astype(jnp.float32) + pos_ref[...].astype(jnp.float32)
        # Mask padded rows of the (possibly ragged) last tile before accumulating.
        rows = i * tile_s + lax.broadcasted_iota(jnp.int32, (tile_s, 1, 1), 0)
        y = jnp.where(rows < S, y, 0.0)
        y_scr[i] = y
        sum_scr[...] += jnp.sum(y, axis=(0, 1), keepdims=True)
        sq_scr[...] += jnp.sum(y * y, axis=(0, 1), keepdims=True)

    @pl.when(phase == 1)
    def _():
        @pl.when(i == 0)
        def _():
            mean = sum_scr[...] * inv_n
            var = jnp.maximum(sq_scr[...] * inv_n - mean * mean, 0.0)  # biased var
            scale = lax.rsqrt(var + EPS) * gamma_ref[...]
            scale_scr[...] = scale
            shift_scr[...] = beta_ref[...] - mean * scale

        o_ref[...] = (y_scr[i] * scale_scr[...] + shift_scr[...]).astype(o_ref.dtype)


def _stats_kernel(x_ref, pos_ref, sum_ref, sq_ref, *, tile_s, S, tiles_per_shard):
    """Tiled pass 1: per-channel sum / sum-of-squares of y = x + pos.

    grid = (num_shards, tiles_per_shard); leading axis is "parallel" so on v7x the two
    shards land on different TensorCores; each shard owns its own (1,1,D) accumulator.
    """
    c = pl.program_id(0)
    i = pl.program_id(1)

    @pl.when(i == 0)
    def _():
        sum_ref[...] = jnp.zeros_like(sum_ref)
        sq_ref[...] = jnp.zeros_like(sq_ref)

    # Global row indices of this (unclamped) tile: masks both the ragged tail of the
    # last real tile and fully-duplicate clamped tiles of an uneven shard split.
    raw_tile = c * tiles_per_shard + i
    rows = raw_tile * tile_s + lax.broadcasted_iota(jnp.int32, (tile_s, 1, 1), 0)

    y = x_ref[...].astype(jnp.float32) + pos_ref[...].astype(jnp.float32)
    y = jnp.where(rows < S, y, 0.0)
    sum_ref[...] += jnp.sum(y, axis=(0, 1), keepdims=True)
    sq_ref[...] += jnp.sum(y * y, axis=(0, 1), keepdims=True)


def _norm_kernel(x_ref, pos_ref, scale_ref, shift_ref, o_ref):
    """Tiled pass 2: out = (x + pos) * scale + shift (ragged writes auto-masked)."""
    y = x_ref[...].astype(jnp.float32) + pos_ref[...].astype(jnp.float32)
    o_ref[...] = (y * scale_ref[...] + shift_ref[...]).astype(o_ref.dtype)


# ---------------------------------------------------------------------------
# Paths
# ---------------------------------------------------------------------------

def _fused_path(x, pos3, gamma3, beta3, vmem_limit, tile_s, donate_x):
    S, B, D = x.shape
    itemsize = x.dtype.itemsize
    padded_row = _round_up(B, 8) * _round_up(D, 128)     # VMEM elems per S-row (padded)
    row_vmem = padded_row * itemsize

    if tile_s is None:
        x_bytes = S * row_vmem
        target = min(max(x_bytes // 12, 512 * 1024), 4 * 1024 * 1024)
        tile_s = max(1, min(S, target // max(1, row_vmem)))
    else:
        tile_s = max(1, min(S, int(tile_s)))
    num_tiles = pl.cdiv(S, tile_s)

    kernel = functools.partial(_fused_kernel, tile_s=tile_s, S=S, inv_n=1.0 / (S * B))

    return pl.pallas_call(
        kernel,
        grid=(2, num_tiles),
        out_shape=jax.ShapeDtypeStruct((S, B, D), x.dtype),
        in_specs=[
            # phase 0: walk tiles; phase 1: pin to the last tile (no redundant DMAs).
            pl.BlockSpec((tile_s, B, D),
                         lambda p, i: (i * (1 - p) + (num_tiles - 1) * p, 0, 0)),
            pl.BlockSpec((tile_s, 1, D),
                         lambda p, i: (i * (1 - p) + (num_tiles - 1) * p, 0, 0)),
            pl.BlockSpec((1, 1, D), lambda p, i: (0, 0, 0)),
            pl.BlockSpec((1, 1, D), lambda p, i: (0, 0, 0)),
        ],
        # phase 0 parks on block 0 (never written, never flushed); phase 1 walks tiles
        # so write-back of tile i-1 overlaps with normalizing tile i.
        out_specs=pl.BlockSpec((tile_s, B, D), lambda p, i: (i * p, 0, 0)),
        scratch_shapes=[
            pltpu.VMEM((num_tiles, tile_s, B, D), jnp.float32),   # resident y = x + pos
            pltpu.VMEM((1, 1, D), jnp.float32),                   # sum
            pltpu.VMEM((1, 1, D), jnp.float32),                   # sum of squares
            pltpu.VMEM((1, 1, D), jnp.float32),                   # fused scale
            pltpu.VMEM((1, 1, D), jnp.float32),                   # fused shift
        ],
        input_output_aliases={0: 0} if donate_x else {},
        compiler_params=pltpu.CompilerParams(
            dimension_semantics=("arbitrary", "arbitrary"),
            vmem_limit_bytes=vmem_limit),
    )(x, pos3, gamma3, beta3)


def _tiled_path(x, pos3, gamma3, beta3, vmem_limit, stats_tile_s, norm_tile_s, donate_x):
    S, B, D = x.shape
    itemsize = x.dtype.itemsize
    padded_row = _round_up(B, 8) * _round_up(D, 128)
    pos_row = 8 * _round_up(D, 128) * 4                  # padded pos block bytes / row

    # ---- Pass 1: per-channel statistics (no output block -> larger tile) ----------
    if stats_tile_s is None:
        per_row = padded_row * (2 * itemsize + 8) + 2 * pos_row
        stats_tile_s = (vmem_limit // 2) // per_row
    stats_tile_s = max(1, min(S, int(stats_tile_s)))
    num_tiles1 = pl.cdiv(S, stats_tile_s)
    num_shards = 2 if num_tiles1 >= 2 else 1             # megacore sharding on v7x
    tiles_per_shard = pl.cdiv(num_tiles1, num_shards)

    def x_map(c, i):
        # Clamp so an uneven shard split never issues an out-of-range DMA; the
        # duplicate tile's contribution is masked to zero inside the kernel.
        return (jnp.minimum(c * tiles_per_shard + i, num_tiles1 - 1), 0, 0)

    stats_kernel = functools.partial(
        _stats_kernel, tile_s=stats_tile_s, S=S, tiles_per_shard=tiles_per_shard)

    s_parts, sq_parts = pl.pallas_call(
        stats_kernel,
        grid=(num_shards, tiles_per_shard),
        out_shape=(jax.ShapeDtypeStruct((num_shards, 1, D), jnp.float32),
                   jax.ShapeDtypeStruct((num_shards, 1, D), jnp.float32)),
        in_specs=[
            pl.BlockSpec((stats_tile_s, B, D), x_map),
            pl.BlockSpec((stats_tile_s, 1, D), x_map),
        ],
        out_specs=[
            pl.BlockSpec((1, 1, D), lambda c, i: (c, 0, 0)),
            pl.BlockSpec((1, 1, D), lambda c, i: (c, 0, 0)),
        ],
        compiler_params=pltpu.CompilerParams(
            dimension_semantics=("parallel", "arbitrary"),
            vmem_limit_bytes=vmem_limit),
    )(x, pos3)

    # Fused per-channel affine computed once in the wrapper (tiny (1,1,D) math).
    n = jnp.float32(S * B)
    s = jnp.sum(s_parts, axis=0, keepdims=True)          # (1, 1, D)
    sq = jnp.sum(sq_parts, axis=0, keepdims=True)        # (1, 1, D)
    mean = s / n
    var = jnp.maximum(sq / n - mean * mean, 0.0)          # biased var (PyTorch BN)
    scale = lax.rsqrt(var + EPS) * gamma3
    shift = beta3 - mean * scale

    # ---- Pass 2: normalize (independent tiles -> "parallel", megacore-shardable) --
    if norm_tile_s is None:
        per_row = padded_row * (4 * itemsize + 8) + 2 * pos_row
        norm_tile_s = (vmem_limit // 2) // per_row
    norm_tile_s = max(1, min(S, int(norm_tile_s)))
    num_tiles2 = pl.cdiv(S, norm_tile_s)

    return pl.pallas_call(
        _norm_kernel,
        grid=(num_tiles2,),
        out_shape=jax.ShapeDtypeStruct((S, B, D), x.dtype),
        in_specs=[
            pl.BlockSpec((norm_tile_s, B, D), lambda i: (i, 0, 0)),
            pl.BlockSpec((norm_tile_s, 1, D), lambda i: (i, 0, 0)),
            pl.BlockSpec((1, 1, D), lambda i: (0, 0, 0)),   # invariant scale
            pl.BlockSpec((1, 1, D), lambda i: (0, 0, 0)),   # invariant shift
        ],
        out_specs=pl.BlockSpec((norm_tile_s, B, D), lambda i: (i, 0, 0)),
        input_output_aliases={0: 0} if donate_x else {},
        compiler_params=pltpu.CompilerParams(
            dimension_semantics=("parallel",),
            vmem_limit_bytes=vmem_limit),
    )(x, pos3, scale, shift)


# ---------------------------------------------------------------------------
# Wrapper
# ---------------------------------------------------------------------------

def learned_positional_encoding(x, pos_embed_weight, gamma, beta, *,
                                force_path=None, fused_tile_s=None,
                                stats_tile_s=None, norm_tile_s=None,
                                donate_x=False):
    """x: (S, B, D); pos_embed_weight: (max_len, D); gamma/beta: (D,)."""
    S, B, D = x.shape
    pos3 = pos_embed_weight[:S].reshape(S, 1, D)          # glue: static embedding slice
    gamma3 = gamma.reshape(1, 1, D).astype(jnp.float32)
    beta3 = beta.reshape(1, 1, D).astype(jnp.float32)

    cap, vmem_limit = _vmem_budget()

    # Fused-path window: dtype/VMEM-aware, using the (8,128)-padded f32 scratch size.
    x_f32_vmem = S * _round_up(B, 8) * _round_up(D, 128) * 4
    fused_budget = (vmem_limit * 3) // 5                   # leave ~40% for DMA buffers
    if cap <= 96 * 1024 * 1024:                            # v7x-class: 64 MiB per TC
        # Prefer the tiled path (both TCs + 3.2 TB/s HBM) above ~12 MiB on v7x.
        fused_budget = min(fused_budget, 12 * 1024 * 1024)
    fused_budget = max(fused_budget, 2 * 1024 * 1024)

    if force_path == "fused":
        use_fused = True
    elif force_path == "tiled":
        use_fused = False
    else:
        use_fused = x_f32_vmem <= fused_budget

    if use_fused:
        return _fused_path(x, pos3, gamma3, beta3, vmem_limit, fused_tile_s, donate_x)
    return _tiled_path(x, pos3, gamma3, beta3, vmem_limit,
                       stats_tile_s, norm_tile_s, donate_x)


# ---------------------------------------------------------------------------
# Reference + test
# ---------------------------------------------------------------------------

def _reference(x, pos_embed_weight, gamma, beta):
    S, B, D = x.shape
    y = x + pos_embed_weight[:S][:, None, :]
    mean = jnp.mean(y, axis=(0, 1), keepdims=True)
    var = jnp.mean((y - mean) ** 2, axis=(0, 1), keepdims=True)
    return (y - mean) / jnp.sqrt(var + EPS) * gamma[None, None, :] + beta[None, None, :]


if __name__ == "__main__":
    d_model = 32
    max_len = 64

    key = jax.random.PRNGKey(0)
    kx1, kx2, kx3, kw = jax.random.split(key, 4)

    pos_w = jax.random.normal(kw, (max_len, d_model), dtype=jnp.float32)
    gamma = jnp.ones((d_model,), dtype=jnp.float32)   # BatchNorm1d default init
    beta = jnp.zeros((d_model,), dtype=jnp.float32)

    # Case 1: small shape -> default (pipelined fused, single tile).
    S1, B1 = 8, 4
    x1 = jax.random.normal(kx1, (S1, B1, d_model), dtype=jnp.float32)
    out1 = jax.block_until_ready(learned_positional_encoding(x1, pos_w, gamma, beta))
    ref1 = _reference(x1, pos_w, gamma, beta)
    assert out1.shape == ref1.shape
    assert jnp.allclose(out1, ref1, atol=1e-4, rtol=1e-4), "fused (single tile) mismatch"

    # Case 2: pipelined fused path with a ragged multi-tile grid (masking exercised).
    S2, B2 = 10, 4
    x2 = jax.random.normal(kx2, (S2, B2, d_model), dtype=jnp.float32)
    out2 = jax.block_until_ready(
        learned_positional_encoding(x2, pos_w, gamma, beta,
                                    force_path="fused", fused_tile_s=4))
    ref2 = _reference(x2, pos_w, gamma, beta)
    assert jnp.allclose(out2, ref2, atol=1e-4, rtol=1e-4), "fused (multi tile) mismatch"

    # Case 3: tiled two-pass path -- ragged S, 2-shard stats grid incl. a clamped tile.
    S3, B3 = 13, 4
    x3 = jax.random.normal(kx3, (S3, B3, d_model), dtype=jnp.float32)
    out3 = jax.block_until_ready(
        learned_positional_encoding(x3, pos_w, gamma, beta,
                                    force_path="tiled", stats_tile_s=3, norm_tile_s=4))
    ref3 = _reference(x3, pos_w, gamma, beta)
    assert jnp.allclose(out3, ref3, atol=1e-4, rtol=1e-4), "tiled path mismatch"

    print("KERNEL_OK")
</pallas_src>

<mosaic_0001>
module attributes {stable_mosaic.version = 11 : i64} {
  func.func @_fused_kernel(%arg0: i32, %arg1: i32, %arg2: memref<8x4x32xf32, #tpu.memory_space<vmem>>, %arg3: memref<8x1x32xf32, #tpu.memory_space<vmem>>, %arg4: memref<1x1x32xf32, #tpu.memory_space<vmem>>, %arg5: memref<1x1x32xf32, #tpu.memory_space<vmem>>, %arg6: memref<8x4x32xf32, #tpu.memory_space<vmem>>, %arg7: memref<1x8x4x32xf32, #tpu.memory_space<vmem>>, %arg8: memref<1x1x32xf32, #tpu.memory_space<vmem>>, %arg9: memref<1x1x32xf32, #tpu.memory_space<vmem>>, %arg10: memref<1x1x32xf32, #tpu.memory_space<vmem>>, %arg11: memref<1x1x32xf32, #tpu.memory_space<vmem>>) attributes {dimension_semantics = [#tpu.dimension_semantics<arbitrary>, #tpu.dimension_semantics<arbitrary>], iteration_bounds = array<i64: 2, 1>, scalar_prefetch = 0 : i64, scratch_operands = 5 : i64, tpu.core_type = #tpu.core_type<tc>, window_params = [{transform_indices = @transform_0, window_bounds = array<i64: 8, 4, 32>}, {transform_indices = @transform_1, window_bounds = array<i64: 8, 1, 32>}, {pipeline_mode = #tpu.pipeline_mode<synchronous>, transform_indices = @transform_2, window_bounds = array<i64: 1, 1, 32>}, {pipeline_mode = #tpu.pipeline_mode<synchronous>, transform_indices = @transform_3, window_bounds = array<i64: 1, 1, 32>}, {transform_indices = @transform_4, window_bounds = array<i64: 8, 4, 32>}]} {
    %c0_i32 = arith.constant 0 : i32
    %0 = arith.cmpi eq, %arg0, %c0_i32 : i32
    %1 = arith.extui %0 : i1 to i32
    %c0_i32_0 = arith.constant 0 : i32
    %2 = arith.cmpi ne, %1, %c0_i32_0 : i32
    scf.if %2 {
      %c0_i32_2 = arith.constant 0 : i32
      %6 = arith.cmpi eq, %arg1, %c0_i32_2 : i32
      %7 = arith.extui %6 : i1 to i32
      %c0_i32_3 = arith.constant 0 : i32
      %8 = arith.cmpi ne, %7, %c0_i32_3 : i32
      scf.if %8 {
        %cst_27 = arith.constant 0.000000e+00 : f32
        %38 = vector.broadcast %cst_27 : f32 to vector<1x1x32xf32>
        %c0_28 = arith.constant 0 : index
        %c0_29 = arith.constant 0 : index
        %c0_30 = arith.constant 0 : index
        %39 = vector.load %arg8[%c0_28, %c0_29, %c0_30] : memref<1x1x32xf32, #tpu.memory_space<vmem>>, vector<1x1x32xf32>
        tpu.vector_store %arg8[%c0_28, %c0_29, %c0_30], %38 {strides = array<i32>} : memref<1x1x32xf32, #tpu.memory_space<vmem>>, vector<1x1x32xf32>,
        %cst_31 = arith.constant 0.000000e+00 : f32
        %40 = vector.broadcast %cst_31 : f32 to vector<1x1x32xf32>
        %c0_32 = arith.constant 0 : index
        %c0_33 = arith.constant 0 : index
        %c0_34 = arith.constant 0 : index
        %41 = vector.load %arg9[%c0_32, %c0_33, %c0_34] : memref<1x1x32xf32, #tpu.memory_space<vmem>>, vector<1x1x32xf32>
        tpu.vector_store %arg9[%c0_32, %c0_33, %c0_34], %40 {strides = array<i32>} : memref<1x1x32xf32, #tpu.memory_space<vmem>>, vector<1x1x32xf32>,
      } else {
      }
      %c0 = arith.constant 0 : index
      %c0_4 = arith.constant 0 : index
      %c0_5 = arith.constant 0 : index
      %9 = vector.load %arg2[%c0, %c0_4, %c0_5] : memref<8x4x32xf32, #tpu.memory_space<vmem>>, vector<8x4x32xf32>
      %c0_6 = arith.constant 0 : index
      %c0_7 = arith.constant 0 : index
      %c0_8 = arith.constant 0 : index
      %10 = vector.load %arg3[%c0_6, %c0_7, %c0_8] : memref<8x1x32xf32, #tpu.memory_space<vmem>>, vector<8x1x32xf32>
      %11 = vector.broadcast %10 : vector<8x1x32xf32> to vector<8x4x32xf32>
      %12 = arith.addf %9, %11 : vector<8x4x32xf32>
      %c8_i32 = arith.constant 8 : i32
      %13 = arith.muli %arg1, %c8_i32 : i32
      %14 = tpu.iota {dimensions = array<i32: 0>} : vector<8x1x1xi32>
      %15 = vector.broadcast %13 : i32 to vector<8x1x1xi32>
      %16 = arith.addi %15, %14 : vector<8x1x1xi32>
      %c8_i32_9 = arith.constant 8 : i32
      %17 = vector.broadcast %c8_i32_9 : i32 to vector<8x1x1xi32>
      %18 = arith.cmpi slt, %16, %17 : vector<8x1x1xi32>
      %cst = arith.constant 0.000000e+00 : f32
      %19 = vector.shape_cast %18 : vector<8x1x1xi1> to vector<8x1x1xi1>
      %20 = vector.broadcast %19 : vector<8x1x1xi1> to vector<8x4x32xi1>
      %21 = vector.broadcast %cst : f32 to vector<8x4x32xf32>
      %22 = arith.select %20, %12, %21 : vector<8x4x32xi1>, vector<8x4x32xf32>
      %23 = arith.index_cast %arg1 : i32 to index
      %c0_10 = arith.constant 0 : index
      %c0_11 = arith.constant 0 : index
      %c0_12 = arith.constant 0 : index
      %24 = vector.load %arg7[%23, %c0_10, %c0_11, %c0_12] : memref<1x8x4x32xf32, #tpu.memory_space<vmem>>, vector<1x8x4x32xf32>
      %25 = vector.shape_cast %24 : vector<1x8x4x32xf32> to vector<8x4x32xf32>
      %26 = vector.shape_cast %22 : vector<8x4x32xf32> to vector<1x8x4x32xf32>
      tpu.vector_store %arg7[%23, %c0_10, %c0_11, %c0_12], %26 {strides = array<i32>} : memref<1x8x4x32xf32, #tpu.memory_space<vmem>>, vector<1x8x4x32xf32>,
      %c0_13 = arith.constant 0 : index
      %c0_14 = arith.constant 0 : index
      %c0_15 = arith.constant 0 : index
      %27 = vector.load %arg8[%c0_13, %c0_14, %c0_15] : memref<1x1x32xf32, #tpu.memory_space<vmem>>, vector<1x1x32xf32>
      %cst_16 = arith.constant dense<0.000000e+00> : vector<32xf32>
      %28 = vector.multi_reduction <add>, %22, %cst_16 [0, 1] : vector<8x4x32xf32> to vector<32xf32>
      %29 = vector.shape_cast %28 : vector<32xf32> to vector<1x1x32xf32>
      %30 = arith.addf %27, %29 : vector<1x1x32xf32>
      %c0_17 = arith.constant 0 : index
      %c0_18 = arith.constant 0 : index
      %c0_19 = arith.constant 0 : index
      %31 = vector.load %arg8[%c0_17, %c0_18, %c0_19] : memref<1x1x32xf32, #tpu.memory_space<vmem>>, vector<1x1x32xf32>
      tpu.vector_store %arg8[%c0_17, %c0_18, %c0_19], %30 {strides = array<i32>} : memref<1x1x32xf32, #tpu.memory_space<vmem>>, vector<1x1x32xf32>,
      %c0_20 = arith.constant 0 : index
      %c0_21 = arith.constant 0 : index
      %c0_22 = arith.constant 0 : index
      %32 = vector.load %arg9[%c0_20, %c0_21, %c0_22] : memref<1x1x32xf32, #tpu.memory_space<vmem>>, vector<1x1x32xf32>
      %33 = arith.mulf %22, %22 : vector<8x4x32xf32>
      %cst_23 = arith.constant dense<0.000000e+00> : vector<32xf32>
      %34 = vector.multi_reduction <add>, %33, %cst_23 [0, 1] : vector<8x4x32xf32> to vector<32xf32>
      %35 = vector.shape_cast %34 : vector<32xf32> to vector<1x1x32xf32>
      %36 = arith.addf %32, %35 : vector<1x1x32xf32>
      %c0_24 = arith.constant 0 : index
      %c0_25 = arith.constant 0 : index
      %c0_26 = arith.constant 0 : index
      %37 = vector.load %arg9[%c0_24, %c0_25, %c0_26] : memref<1x1x32xf32, #tpu.memory_space<vmem>>, vector<1x1x32xf32>
      tpu.vector_store %arg9[%c0_24, %c0_25, %c0_26], %36 {strides = array<i32>} : memref<1x1x32xf32, #tpu.memory_space<vmem>>, vector<1x1x32xf32>,
    } else {
    }
    %c1_i32 = arith.constant 1 : i32
    %3 = arith.cmpi eq, %arg0, %c1_i32 : i32
    %4 = arith.extui %3 : i1 to i32
    %c0_i32_1 = arith.constant 0 : i32
    %5 = arith.cmpi ne, %4, %c0_i32_1 : i32
    scf.if %5 {
      %c0_i32_2 = arith.constant 0 : i32
      %6 = arith.cmpi eq, %arg1, %c0_i32_2 : i32
      %7 = arith.extui %6 : i1 to i32
      %c0_i32_3 = arith.constant 0 : i32
      %8 = arith.cmpi ne, %7, %c0_i32_3 : i32
      scf.if %8 {
        %c0_15 = arith.constant 0 : index
        %c0_16 = arith.constant 0 : index
        %c0_17 = arith.constant 0 : index
        %19 = vector.load %arg8[%c0_15, %c0_16, %c0_17] : memref<1x1x32xf32, #tpu.memory_space<vmem>>, vector<1x1x32xf32>
        %cst = arith.constant 3.125000e-02 : f32
        %20 = vector.broadcast %cst : f32 to vector<1x1x32xf32>
        %21 = arith.mulf %19, %20 : vector<1x1x32xf32>
        %c0_18 = arith.constant 0 : index
        %c0_19 = arith.constant 0 : index
        %c0_20 = arith.constant 0 : index
        %22 = vector.load %arg9[%c0_18, %c0_19, %c0_20] : memref<1x1x32xf32, #tpu.memory_space<vmem>>, vector<1x1x32xf32>
        %cst_21 = arith.constant 3.125000e-02 : f32
        %23 = vector.broadcast %cst_21 : f32 to vector<1x1x32xf32>
        %24 = arith.mulf %22, %23 : vector<1x1x32xf32>
        %25 = arith.mulf %21, %21 : vector<1x1x32xf32>
        %26 = arith.subf %24, %25 : vector<1x1x32xf32>
        %cst_22 = arith.constant 0.000000e+00 : f32
        %27 = vector.broadcast %cst_22 : f32 to vector<1x1x32xf32>
        %28 = arith.maximumf %26, %27 : vector<1x1x32xf32>
        %cst_23 = arith.constant 9.99999974E-6 : f32
        %29 = vector.broadcast %cst_23 : f32 to vector<1x1x32xf32>
        %30 = arith.addf %28, %29 : vector<1x1x32xf32>
        %31 = math.rsqrt %30 : vector<1x1x32xf32>
        %c0_24 = arith.constant 0 : index
        %c0_25 = arith.constant 0 : index
        %c0_26 = arith.constant 0 : index
        %32 = vector.load %arg4[%c0_24, %c0_25, %c0_26] : memref<1x1x32xf32, #tpu.memory_space<vmem>>, vector<1x1x32xf32>
        %33 = arith.mulf %31, %32 : vector<1x1x32xf32>
        %c0_27 = arith.constant 0 : index
        %c0_28 = arith.constant 0 : index
        %c0_29 = arith.constant 0 : index
        %34 = vector.load %arg10[%c0_27, %c0_28, %c0_29] : memref<1x1x32xf32, #tpu.memory_space<vmem>>, vector<1x1x32xf32>
        tpu.vector_store %arg10[%c0_27, %c0_28, %c0_29], %33 {strides = array<i32>} : memref<1x1x32xf32, #tpu.memory_space<vmem>>, vector<1x1x32xf32>,
        %c0_30 = arith.constant 0 : index
        %c0_31 = arith.constant 0 : index
        %c0_32 = arith.constant 0 : index
        %35 = vector.load %arg5[%c0_30, %c0_31, %c0_32] : memref<1x1x32xf32, #tpu.memory_space<vmem>>, vector<1x1x32xf32>
        %36 = arith.mulf %21, %33 : vector<1x1x32xf32>
        %37 = arith.subf %35, %36 : vector<1x1x32xf32>
        %c0_33 = arith.constant 0 : index
        %c0_34 = arith.constant 0 : index
        %c0_35 = arith.constant 0 : index
        %38 = vector.load %arg11[%c0_33, %c0_34, %c0_35] : memref<1x1x32xf32, #tpu.memory_space<vmem>>, vector<1x1x32xf32>
        tpu.vector_store %arg11[%c0_33, %c0_34, %c0_35], %37 {strides = array<i32>} : memref<1x1x32xf32, #tpu.memory_space<vmem>>, vector<1x1x32xf32>,
      } else {
      }
      %9 = arith.index_cast %arg1 : i32 to index
      %c0 = arith.constant 0 : index
      %c0_4 = arith.constant 0 : index
      %c0_5 = arith.constant 0 : index
      %10 = vector.load %arg7[%9, %c0, %c0_4, %c0_5] : memref<1x8x4x32xf32, #tpu.memory_space<vmem>>, vector<1x8x4x32xf32>
      %11 = vector.shape_cast %10 : vector<1x8x4x32xf32> to vector<8x4x32xf32>
      %c0_6 = arith.constant 0 : index
      %c0_7 = arith.constant 0 : index
      %c0_8 = arith.constant 0 : index
      %12 = vector.load %arg10[%c0_6, %c0_7, %c0_8] : memref<1x1x32xf32, #tpu.memory_space<vmem>>, vector<1x1x32xf32>
      %13 = vector.broadcast %12 : vector<1x1x32xf32> to vector<8x4x32xf32>
      %14 = arith.mulf %11, %13 : vector<8x4x32xf32>
      %c0_9 = arith.constant 0 : index
      %c0_10 = arith.constant 0 : index
      %c0_11 = arith.constant 0 : index
      %15 = vector.load %arg11[%c0_9, %c0_10, %c0_11] : memref<1x1x32xf32, #tpu.memory_space<vmem>>, vector<1x1x32xf32>
      %16 = vector.broadcast %15 : vector<1x1x32xf32> to vector<8x4x32xf32>
      %17 = arith.addf %14, %16 : vector<8x4x32xf32>
      %c0_12 = arith.constant 0 : index
      %c0_13 = arith.constant 0 : index
      %c0_14 = arith.constant 0 : index
      %18 = vector.load %arg6[%c0_12, %c0_13, %c0_14] : memref<8x4x32xf32, #tpu.memory_space<vmem>>, vector<8x4x32xf32>
      tpu.vector_store %arg6[%c0_12, %c0_13, %c0_14], %17 {strides = array<i32>} : memref<8x4x32xf32, #tpu.memory_space<vmem>>, vector<8x4x32xf32>,
    } else {
    }
    return
  }
  func.func @transform_0(%arg0: i32, %arg1: i32) -> (i32, i32, i32) {
    %c1_i32 = arith.constant 1 : i32
    %0 = arith.subi %c1_i32, %arg0 : i32
    %1 = arith.muli %arg1, %0 : i32
    %c0_i32 = arith.constant 0 : i32
    %2 = arith.muli %c0_i32, %arg0 : i32
    %3 = arith.addi %1, %2 : i32
    %c0_i32_0 = arith.constant 0 : i32
    %c0_i32_1 = arith.constant 0 : i32
    %c0_i32_2 = arith.constant 0 : i32
    return %3, %c0_i32_0, %c0_i32_1 : i32, i32, i32
  }
  func.func @transform_1(%arg0: i32, %arg1: i32) -> (i32, i32, i32) {
    %c1_i32 = arith.constant 1 : i32
    %0 = arith.subi %c1_i32, %arg0 : i32
    %1 = arith.muli %arg1, %0 : i32
    %c0_i32 = arith.constant 0 : i32
    %2 = arith.muli %c0_i32, %arg0 : i32
    %3 = arith.addi %1, %2 : i32
    %c0_i32_0 = arith.constant 0 : i32
    %c0_i32_1 = arith.constant 0 : i32
    %c0_i32_2 = arith.constant 0 : i32
    return %3, %c0_i32_0, %c0_i32_1 : i32, i32, i32
  }
  func.func @transform_2(%arg0: i32, %arg1: i32) -> (i32, i32, i32) {
    %c0_i32 = arith.constant 0 : i32
    %c0_i32_0 = arith.constant 0 : i32
    %c0_i32_1 = arith.constant 0 : i32
    %c0_i32_2 = arith.constant 0 : i32
    return %c0_i32, %c0_i32_0, %c0_i32_1 : i32, i32, i32
  }
  func.func @transform_3(%arg0: i32, %arg1: i32) -> (i32, i32, i32) {
    %c0_i32 = arith.constant 0 : i32
    %c0_i32_0 = arith.constant 0 : i32
    %c0_i32_1 = arith.constant 0 : i32
    %c0_i32_2 = arith.constant 0 : i32
    return %c0_i32, %c0_i32_0, %c0_i32_1 : i32, i32, i32
  }
  func.func @transform_4(%arg0: i32, %arg1: i32) -> (i32, i32, i32) {
    %0 = arith.muli %arg1, %arg0 : i32
    %c0_i32 = arith.constant 0 : i32
    %c0_i32_0 = arith.constant 0 : i32
    %c0_i32_1 = arith.constant 0 : i32
    return %0, %c0_i32, %c0_i32_0 : i32, i32, i32
  }
}

</mosaic_0001>

<bundles_post_ra>
// kernel: tpu_custom_call.1
= control target key start
LH: loop header
LB: loop body
LE: loop exit
PB: predicated region body
PF: predicated region fallthrough
CT: control target
= control target key end

     0   :  { %9 = vsyncpa [#allocation8], 0  ;;  %s1017_s0 = inlined_call_operand.hbm [shape: f32[8,4,32], index: 0, kind: input, shape index: {}]   ;;  %s1018_s1 = inlined_call_operand.hbm [shape: f32[8,1,32], index: 1, kind: input, shape index: {}]   ;;  %s1019_s2 = inlined_call_operand.vmem [shape: f32[1,1,32], index: 2, kind: input, shape index: {}]   ;;  %s1020_s3 = inlined_call_operand.vmem [shape: f32[1,1,32], index: 3, kind: input, shape index: {}]   ;;  %s1021_s4 = inlined_call_operand.hbm [shape: f32[8,4,32], index: 4, kind: output, shape index: {}]  }
   0x1   :  { %11 = vsyncpa [#allocation8 + $0x1], 0 }
   0x2   :  { %12 = vsyncpa [#allocation11], 0 }
   0x3   :  { %14 = vsyncpa [#allocation11 + $0x1], 0 }
   0x4   :  { %15 = vsyncpa [#allocation9], 0 }
   0x5   :  { %17 = vsyncpa [#allocation9 + $0x1], 0  ;;  %s914_s15 = smov 0   ;;  %s916_s16 = smov 0  }
   0x6   :  { %s918_s17 = smov 0  }
   0x7 LB: > { %s663_s18 = sadd.s32 4294967295, %s877_s17   ;;  %s664_s19 = sadd.s32 4294967294, %s877_s17   ;;  %s877_s17 = sphi %s918_s17, %s23_s17   ;;  %s873_s16 = sphi %s916_s16, %s1024_s16   ;;  %s869_s15 = sphi %s914_s15, %s1023_s15  }
   0x8   : > { %s35_s20 = sadd.s32 1, %s873_s16  ;;  %p666_p0 = scmp.ge.s32.totalorder %s877_s17, 2 }
   0x9   : > { %p37_p1 = scmp.ge.s32.totalorder %s35_s20, 2  ;;  %p701_p2 = scmp.lt.s32.totalorder %s877_s17, 2 }
   0xa   : > { %p702_p3 = scmp.eq.s32.totalorder %s877_s17, 0  ;;  %s201_s23 = sshll.u32 %s1017_s0, 4  ;;  %s202_s23 = int_to_ptr.hbm [resolvable:$true] %s201_s23 }
   0xb   : > { %s1026_s20 = smov (%p37_p1, %s35_s20), 0  ;;  %s879_s24 = smov [#allocation7]  }
   0xc   : > { %s203_s25 = sshll.u32 %s879_s24, 4  ;;  %p940_p4 = pnand %p702_p3, %p701_p2  ;;  %s204_s25 = int_to_ptr.vmem [resolvable:$true] %s203_s25 }
   0xd   : > { %p669_p5 = scmp.ge.s32.totalorder %s877_s17, 1  ;;  %s880_s27 = smov 64  }
   0xe   : > { %s881_s28 = smov 4   ;;  %p234_p6 = scmp.lt.s32.totalorder %s877_s17, 3 }
   0xf   : > { %693 = dma.hbm_to_vmem [thread:$0]  (!%p940_p4), %s202_s23, 512, %s204_s25, [#allocation8], %s880_s27, %s880_s27, %s881_s28  }
  0x10   : > { %s224_s5 = sshll.u32 %s1018_s1, 4  ;;  %p235_p7 = pnand %p669_p5, %p234_p6  ;;  %s225_s5 = int_to_ptr.hbm [resolvable:$true] %s224_s5 }
  0x11   : > { %s882_s6 = smov [#allocation10]   ;;  %s883_s8 = smov 16  }
  0x12   : > { %s226_s7 = sshll.u32 %s882_s6, 4  ;;  %s884_s9 = smov 1   ;;  %s227_s7 = int_to_ptr.vmem [resolvable:$true] %s226_s7 }
  0x13   : > { %696 = dma.hbm_to_vmem [thread:$0]  (!%p940_p4), %s225_s5, 128, %s227_s7, [#allocation11], %s883_s8, %s883_s8, %s884_s9  }
  0x14   : > { %238 = sbr.rel (%p235_p7) target bundleno = 136 (0x88), region = 36  ;;  %p704_p8 = scmp.eq.s32.totalorder (!%p235_p7), %s663_s18, 0 }
  0x19   : > { %856 = dma.done.wait (%p704_p8), [#allocation8], 512  }
  0x1a   : > { %858 = vsyncadd (%p704_p8), [#allocation8], 4294966784 }
  0x1b   : > { %860 = dma.done.wait (%p704_p8), [#allocation11], 128  }
  0x1c   : > { %862 = vsyncadd (%p704_p8), [#allocation11], 4294967168  ;;  %p672_p9 = scmp.ne.s32.totalorder %s869_s15, 0 }
  0x1e   : > { %296 = sbr.rel (%p672_p9) target bundleno = 72 (0x48), region = 48 }
  0x23   : > { %vm301_vm0 = vcmask 253952   ;;  %v304_v0 = vld [vmem:[#allocation7] sm:$0xf]  ;;  %v885_v1 = vmov 0.0   ;;  %vm395_vm1 = vcmask 257024  }
  0x24   : > { %302 = vst.msk [vmem:[#allocation3] sm:$0x1] %vm301_vm0, %v885_v1  ;;  %v743_v2 = vld [vmem:[#allocation10] ss:$0 sm:$0xff]  ;;  %v305_v3 = vld [vmem:[#allocation7 + $0x4] sm:$0xf] }
  0x25   : > { %303 = vst.msk [vmem:[#allocation4] sm:$0x1] %vm301_vm0, %v885_v1  ;;  %v344_v4 = vadd.f32 %v743_v2, %v304_v0  ;;  %v744_v5 = vld [vmem:[#allocation10 + $0x1] ss:$0 sm:$0xff]  ;;  %v306_v6 = vld [vmem:[#allocation7 + $0x8] sm:$0xf] }
  0x26   : > { %v745_v7 = vld [vmem:[#allocation10 + $0x2] ss:$0 sm:$0xff]  ;;  %v307_v8 = vld [vmem:[#allocation7 + $0xc] sm:$0xf]  ;;  %v345_v11 = vadd.f32 %v744_v5, %v305_v3  ;;  %v746_v12 = vld [vmem:[#allocation10 + $0x3] ss:$0 sm:$0xff] }
  0x27   : > { %396 = vst.msk [vmem:[#allocation2] sm:$0xf] %vm395_vm1, %v344_v4  ;;  %v405_v9 = vsel %vm395_vm1, %v344_v4, 0.0  ;;  %v430_v10 = vmul.f32 %v344_v4, %v344_v4  ;;  %v346_v13 = vadd.f32 %v745_v7, %v306_v6  ;;  %v308_v14 = vld [vmem:[#allocation7 + $0x10] sm:$0xf]  ;;  %v347_v19 = vadd.f32 %v746_v12, %v307_v8 }
  0x28   : > { %v747_v15 = vld [vmem:[#allocation10 + $0x4] ss:$0 sm:$0xff]  ;;  %397 = vst.msk [vmem:[#allocation2 + $0x4] sm:$0xf] %vm395_vm1, %v345_v11  ;;  %v406_v17 = vsel %vm395_vm1, %v345_v11, 0.0  ;;  %v431_v18 = vmul.f32 %v345_v11, %v345_v11 }
  0x29   : > { %v438_v16 = vsel %vm395_vm1, %v430_v10, 0.0  ;;  %v309_v20 = vld [vmem:[#allocation7 + $0x14] sm:$0xf]  ;;  %v407_v21 = vadd.f32 %v406_v17, %v405_v9  ;;  %398 = vst.msk [vmem:[#allocation2 + $0x8] sm:$0xf] %vm395_vm1, %v346_v13  ;;  %v408_v22 = vsel %vm395_vm1, %v346_v13, 0.0  ;;  %v432_v23 = vmul.f32 %v346_v13, %v346_v13 }
  0x2a   : > { %v348_v24 = vadd.f32 %v747_v15, %v308_v14  ;;  %v439_v25 = vsel %vm395_vm1, %v431_v18, 0.0  ;;  %399 = vst.msk [vmem:[#allocation2 + $0xc] sm:$0xf] %vm395_vm1, %v347_v19  ;;  %v410_v26 = vsel %vm395_vm1, %v347_v19, 0.0  ;;  %v433_v27 = vmul.f32 %v347_v19, %v347_v19  ;;  %v748_v28 = vld [vmem:[#allocation10 + $0x5] ss:$0 sm:$0xff] }
  0x2b   : > { %v440_v29 = vadd.f32 %v439_v25, %v438_v16  ;;  %v409_v30 = vadd.f32 %v408_v22, %v407_v21  ;;  %v441_v31 = vsel %vm395_vm1, %v432_v23, 0.0  ;;  %v310_v32 = vld [vmem:[#allocation7 + $0x18] sm:$0xf]  ;;  %v349_v36 = vadd.f32 %v748_v28, %v309_v20  ;;  %v749_v37 = vld [vmem:[#allocation10 + $0x6] ss:$0 sm:$0xff] }
  0x2c   : > { %400 = vst.msk [vmem:[#allocation2 + $0x10] sm:$0xf] %vm395_vm1, %v348_v24  ;;  %v443_v33 = vsel %vm395_vm1, %v433_v27, 0.0  ;;  %v412_v34 = vsel %vm395_vm1, %v348_v24, 0.0  ;;  %v434_v35 = vmul.f32 %v348_v24, %v348_v24  ;;  %v311_v40 = vld [vmem:[#allocation7 + $0x1c] sm:$0xf]  ;;  %v350_v45 = vadd.f32 %v749_v37, %v310_v32 }
  0x2d   : > { %v442_v38 = vadd.f32 %v441_v31, %v440_v29  ;;  %v411_v39 = vadd.f32 %v410_v26, %v409_v30  ;;  %v750_v41 = vld [vmem:[#allocation10 + $0x7] ss:$0 sm:$0xff]  ;;  %401 = vst.msk [vmem:[#allocation2 + $0x14] sm:$0xf] %vm395_vm1, %v349_v36  ;;  %v414_v43 = vsel %vm395_vm1, %v349_v36, 0.0  ;;  %v435_v44 = vmul.f32 %v349_v36, %v349_v36 }
  0x2e   : > { %v445_v42 = vsel %vm395_vm1, %v434_v35, 0.0  ;;  %v351_v48 = vadd.f32 %v750_v41, %v311_v40  ;;  %402 = vst.msk [vmem:[#allocation2 + $0x18] sm:$0xf] %vm395_vm1, %v350_v45  ;;  %v416_v50 = vsel %vm395_vm1, %v350_v45, 0.0  ;;  %v436_v51 = vmul.f32 %v350_v45, %v350_v45  ;;  %v404_v8 = vld [vmem:[#allocation3] sm:$0x1] }
  0x2f   : > { %v444_v46 = vadd.f32 %v443_v33, %v442_v38  ;;  %v413_v47 = vadd.f32 %v412_v34, %v411_v39  ;;  %v447_v49 = vsel %vm395_vm1, %v435_v44, 0.0  ;;  %v429_v11 = vld [vmem:[#allocation4] sm:$0x1] }
  0x30   : > { %403 = vst.msk [vmem:[#allocation2 + $0x1c] sm:$0xf] %vm395_vm1, %v351_v48  ;;  %v437_v54 = vmul.f32 %v351_v48, %v351_v48  ;;  %v449_v55 = vsel %vm395_vm1, %v436_v51, 0.0  ;;  %v418_v56 = vsel %vm395_vm1, %v351_v48, 0.0 }
  0x31   : > { %v446_v52 = vadd.f32 %v445_v42, %v444_v46  ;;  %v415_v53 = vadd.f32 %v414_v43, %v413_v47 }
  0x32   : > { %v451_v59 = vsel %vm395_vm1, %v437_v54, 0.0 }
  0x33   : > { %v448_v57 = vadd.f32 %v447_v49, %v446_v52  ;;  %v417_v58 = vadd.f32 %v416_v50, %v415_v53 }
  0x35   : > { %v450_v60 = vadd.f32 %v449_v55, %v448_v57  ;;  %v419_v61 = vadd.f32 %v418_v56, %v417_v58 }
  0x37   : > { %v420_v62 = vrot.slane %v419_v61, 4  ;;  %v452_v63 = vadd.f32 %v451_v59, %v450_v60 }
  0x39   : > { %v421_v0 = vadd.f32 %v420_v62, %v419_v61  ;;  %v453_v1 = vrot.slane %v452_v63, 4 }
  0x3b   : > { %v422_v2 = vrot.slane %v421_v0, 2  ;;  %v454_v3 = vadd.f32 %v453_v1, %v452_v63 }
  0x3d   : > { %v423_v4 = vadd.f32 %v422_v2, %v421_v0  ;;  %v455_v5 = vrot.slane %v454_v3, 2 }
  0x3f   : > { %v424_v6 = vrot.slane %v423_v4, 1  ;;  %v456_v7 = vadd.f32 %v455_v5, %v454_v3 }
  0x41   : > { %v425_v9 = vadd.f32 %v424_v6, %v423_v4  ;;  %v457_v10 = vrot.slane %v456_v7, 1 }
  0x43   : > { %v426_v12 = vadd.f32 %v425_v9, %v404_v8  ;;  %v458_v13 = vadd.f32 %v457_v10, %v456_v7 }
  0x45   : > { %428 = vst.msk [vmem:[#allocation3] sm:$0x1] %vm301_vm0, %v426_v12  ;;  %v459_v14 = vadd.f32 %v458_v13, %v429_v11 }
  0x47   : > { %460 = vst.msk [vmem:[#allocation4] sm:$0x1] %vm301_vm0, %v459_v14 }
  0x48 PF: > { %p673_p10 = scmp.ne.s32.totalorder %s869_s15, 1 }
  0x4a   : > { %464 = sbr.rel (%p673_p10) target bundleno = 132 (0x84), region = 56 }
  0x4f   : > { %v469_v15 = vld [vmem:[#allocation3] sm:$0x1]  ;;  %v471_v16 = vld [vmem:[#allocation4] sm:$0x1]  ;;  %vm489_vm5 = vcmask 253952   ;;  %vm529_vm6 = vcmask 257024  }
  0x50   : > { %v470_v17 = vmul.f32 0.03125, %v469_v15  ;;  %v472_v18 = vmul.f32 0.03125, %v471_v16  ;;  %v487_v29 = vld [vmem:[%s1019_s2] sm:$0x1]  ;;  %v498_v36 = vld [vmem:[#allocation2 + $0x4] sm:$0xf] }
  0x51   : > { %v491_v32 = vld [vmem:[%s1020_s3] sm:$0x1]  ;;  %v499_v37 = vld [vmem:[#allocation2 + $0x8] sm:$0xf]  ;;  %v500_v39 = vld [vmem:[#allocation2 + $0xc] sm:$0xf] }
  0x52   : > { %v473_v19 = vmul.f32 %v470_v17, %v470_v17  ;;  %v497_v35 = vld [vmem:[#allocation2] sm:$0xf]  ;;  %v501_v40 = vld [vmem:[#allocation2 + $0x10] sm:$0xf]  ;;  %v502_v44 = vld [vmem:[#allocation2 + $0x14] sm:$0xf] }
  0x53   : > { %v503_v46 = vld [vmem:[#allocation2 + $0x18] sm:$0xf]  ;;  %v504_v49 = vld [vmem:[#allocation2 + $0x1c] sm:$0xf] }
  0x54   : > { %v474_v20 = vsub.f32 %v472_v18, %v473_v19 }
  0x56   : > { %v475_v21 = vmax.f32 %v474_v20, 0.0 }
  0x58   : > { %v476_v22 = vadd.f32 1e-05, %v475_v21 }
  0x5a   : > { %753 = vrsqrt.f32 %v476_v22  ;;  %vm483_vm2 = vweird.f32 %v476_v22 }
  0x60   : > { %v754_v23 = vpop.eup %753 }
  0x61   : > { %v478_v24 = vmul.f32 %v754_v23, %v476_v22  ;;  %vm484_vm3 = vweird.f32 %v754_v23 }
  0x62   : > { %vm485_vm4 = vmor %vm483_vm2, %vm484_vm3 }
  0x63   : > { %v479_v25 = vmul.f32 %v754_v23, %v478_v24 }
  0x65   : > { %v480_v26 = vmul.f32 0.5, %v479_v25 }
  0x67   : > { %v481_v27 = vsub.f32 1.5, %v480_v26 }
  0x69   : > { %v482_v28 = vmul.f32 %v754_v23, %v481_v27 }
  0x6b   : > { %v486_v30 = vsel %vm485_vm4, %v754_v23, %v482_v28 }
  0x6c   : > { %v488_v31 = vmul.f32 %v487_v29, %v486_v30 }
  0x6e   : > { %490 = vst.msk [vmem:[#allocation5] sm:$0x1] %vm489_vm5, %v488_v31  ;;  %v492_v33 = vmul.f32 %v488_v31, %v470_v17 }
  0x70   : > { %v493_v34 = vsub.f32 %v491_v32, %v492_v33 }
  0x72   : > { %494 = vst.msk [vmem:[#allocation6] sm:$0x1] %vm489_vm5, %v493_v34 }
  0x75   : > { %v751_v38 = vld [vmem:[#allocation5] ss:$0 sm:$0xff] }
  0x76   : > { %v509_v41 = vmul.f32 %v751_v38, %v497_v35  ;;  %v510_v42 = vmul.f32 %v751_v38, %v498_v36  ;;  %v511_v43 = vmul.f32 %v751_v38, %v499_v37  ;;  %v512_v45 = vmul.f32 %v751_v38, %v500_v39 }
  0x77   : > { %v513_v48 = vmul.f32 %v751_v38, %v501_v40  ;;  %v514_v50 = vmul.f32 %v751_v38, %v502_v44  ;;  %v515_v54 = vmul.f32 %v751_v38, %v503_v46  ;;  %v516_v56 = vmul.f32 %v751_v38, %v504_v49 }
  0x79   : > { %v752_v47 = vld [vmem:[#allocation6] ss:$0 sm:$0xff] }
  0x7a   : > { %v521_v51 = vadd.f32 %v752_v47, %v509_v41  ;;  %v522_v52 = vadd.f32 %v752_v47, %v510_v42  ;;  %v523_v53 = vadd.f32 %v752_v47, %v511_v43  ;;  %v524_v55 = vadd.f32 %v752_v47, %v512_v45 }
  0x7b   : > { %v525_v57 = vadd.f32 %v752_v47, %v513_v48  ;;  %v526_v58 = vadd.f32 %v752_v47, %v514_v50  ;;  %v527_v59 = vadd.f32 %v752_v47, %v515_v54  ;;  %v528_v60 = vadd.f32 %v752_v47, %v516_v56 }
  0x7c   : > { %530 = vst.msk [vmem:[#allocation12] sm:$0xf] %vm529_vm6, %v521_v51 }
  0x7d   : > { %531 = vst.msk [vmem:[#allocation12 + $0x4] sm:$0xf] %vm529_vm6, %v522_v52 }
  0x7e   : > { %532 = vst.msk [vmem:[#allocation12 + $0x8] sm:$0xf] %vm529_vm6, %v523_v53 }
  0x7f   : > { %533 = vst.msk [vmem:[#allocation12 + $0xc] sm:$0xf] %vm529_vm6, %v524_v55 }
  0x80   : > { %534 = vst.msk [vmem:[#allocation12 + $0x10] sm:$0xf] %vm529_vm6, %v525_v57 }
  0x81   : > { %535 = vst.msk [vmem:[#allocation12 + $0x14] sm:$0xf] %vm529_vm6, %v526_v58 }
  0x82   : > { %536 = vst.msk [vmem:[#allocation12 + $0x18] sm:$0xf] %vm529_vm6, %v527_v59 }
  0x83   : > { %537 = vst.msk [vmem:[#allocation12 + $0x1c] sm:$0xf] %vm529_vm6, %v528_v60 }
  0x84 PF: > { %p706_p11 = scmp.eq.s32.totalorder %s663_s18, 1  ;;  %s554_s21 = sshll.u32 %s1021_s4, 4  ;;  %s555_s21 = int_to_ptr.hbm [resolvable:$true] %s554_s21 }
  0x85   : > { %s886_s22 = smov [#allocation12]   ;;  %s887_s24 = smov 64  }
  0x86   : > { %s552_s23 = sshll.u32 %s886_s22, 4  ;;  %s888_s25 = smov 4   ;;  %s553_s23 = int_to_ptr.vmem [resolvable:$true] %s552_s23 }
  0x87   : > { %687 = dma.vmem_to_hbm [thread:$0]  (%p706_p11), %s553_s23, 512, %s555_s21, [#allocation9], %s887_s24, %s887_s24, %s888_s25  }
  0x88 PF: > { %p708_p12 = scmp.eq.s32.totalorder %s664_s19, 1 }
  0x8a   : > { %p698_p13 = pnand %p708_p12, %p666_p0 }
  0x8c   : > { %p699_p1 = pneg %p698_p13 }
  0x8e   : > { %864 = dma.done.wait (%p699_p1), [#allocation9], 512  }
  0x8f   : > { %866 = vsyncadd (%p699_p1), [#allocation9], 4294966784  ;;  %s23_s17 = sadd.s32 1, %s877_s17   ;;  %s1023_s15 = smov %s873_s16 }
  0x90   : > { %p20_p2 = scmp.ge.s32.totalorder %s23_s17, 4   ;;  %s1024_s16 = smov %s1026_s20 }
  0x92   :  { %22 = sbr.rel (!%p20_p2) target bundleno = 7 (0x7), region = 112 }
  0x97   :  { %576 = vsyncpa [#allocation8], 1 }
  0x98   :  { %578 = vsyncpa [#allocation8 + $0x1], 1 }
  0x99   :  { %579 = vsyncpa [#allocation11], 1 }
  0x9a   :  { %581 = vsyncpa [#allocation11 + $0x1], 1 }
  0x9b   :  { %582 = vsyncpa [#allocation9], 1 }
  0x9c   :  { %584 = vsyncpa [#allocation9 + $0x1], 1 }

</bundles_post_ra>
